<compile_context>
chip_gen: v6e
topology: v6e:2x2x1
jax: 0.10.0
libtpu: 0.0.40
codegen_flags: <defaults>
</compile_context>

<pallas_src>
import jax
import jax.numpy as jnp
from jax.experimental import pallas as pl
from jax.experimental.pallas import tpu as pltpu


def _round_up(x, m):
    return (x + m - 1) // m * m


def _supports_pipeline_mode():
    """Narrow feature-detect for BlockSpec(pipeline_mode=pl.Buffered(1))."""
    try:
        pl.BlockSpec((8, 128), lambda i: (0, 0), pipeline_mode=pl.Buffered(1))
        return True
    except (TypeError, AttributeError):
        return False


_HAS_PIPELINE_MODE = _supports_pipeline_mode()


def _vmem_capacity_bytes():
    try:
        return int(pltpu.get_tpu_info().vmem_capacity_bytes)
    except Exception:
        return 64 * 2**20  # conservative per-TC floor (v7x)


def mlp_kernel(x_ref, w1_ref, b1_ref, w2_ref, b2_ref, w3_ref, b3_ref, o_ref):
    # Layer 1 + ReLU (dropout1 == identity at inference). x cast to the weight
    # dtype so a bf16 weight set runs the full bf16 MXU path; f32 accumulate.
    h = jnp.dot(x_ref[...].astype(w1_ref.dtype), w1_ref[...],
                preferred_element_type=jnp.float32)
    h = jnp.maximum(h + b1_ref[...].astype(jnp.float32), 0.0)
    # Layer 2 + ReLU (dropout2 == identity at inference). Elementwise math
    # stays f32 on the VPU (also the right choice on v5e, which has no bf16 VPU).
    h = jnp.dot(h.astype(w2_ref.dtype), w2_ref[...],
                preferred_element_type=jnp.float32)
    h = jnp.maximum(h + b2_ref[...].astype(jnp.float32), 0.0)
    # Output layer (no activation). N is lane-padded to 128 by the wrapper.
    out = jnp.dot(h.astype(w3_ref.dtype), w3_ref[...],
                  preferred_element_type=jnp.float32)
    o_ref[...] = (out + b3_ref[...].astype(jnp.float32)).astype(o_ref.dtype)


def _choose_block_b(batch, sub):
    """Batch tile: multiple of `sub` (sublane packing of the narrowest dtype).
    Large batches use 512-row tiles (~85% of HBM roofline, amortizes ~0.35us
    per-step overhead); mid-range batches are split into >=4 tiles so v7x's
    two TensorCores each still get >=2 pipelined steps."""
    if batch <= 2 * sub:
        return _round_up(batch, sub)
    if batch <= 512:
        return _round_up(max(batch // 4, sub), sub)
    return 512


def mlp_classifier_forward(x, params, *, block_b=None):
    """Fused 3-layer MLP forward.

    x: (B, input_size). params: dict with w1 (in,h1), b1 (1,h1), w2 (h1,h2),
    b2 (1,h2), w3 (h2,out), b3 (1,out). Weights may be f32 or bf16.
    """
    B, in_dim = x.shape
    h1 = params["w1"].shape[1]
    h2 = params["w2"].shape[1]
    out_dim = params["w3"].shape[1]

    # Lane-dense output: pad the classifier dim to a multiple of 128 with zero
    # weight columns (few KB), slice back after the call.
    out_pad = max(128, _round_up(out_dim, 128))
    w3, b3 = params["w3"], params["b3"]
    if out_pad != out_dim:
        w3 = jnp.pad(w3, ((0, 0), (0, out_pad - out_dim)))
        b3 = jnp.pad(b3, ((0, 0), (0, out_pad - out_dim)))

    # Sublane packing: 8 rows for f32, 16 for bf16, 32 for 8-bit dtypes.
    itemsize = min(x.dtype.itemsize, params["w1"].dtype.itemsize)
    sub = 8 * max(1, 4 // itemsize)

    tb = block_b if block_b is not None else _choose_block_b(B, sub)
    tb = max(sub, _round_up(tb, sub))
    num_tiles = -(-B // tb)            # cdiv; trailing partial block is masked
    grid = (num_tiles,)

    # VMEM budget: weights/biases resident once, double-buffered x/out tiles,
    # f32 intermediates; 2x headroom, clamped to ~80% of this chip's VMEM.
    weight_bytes = (sum(int(p.size) * p.dtype.itemsize
                        for k, p in params.items() if k not in ("w3", "b3"))
                    + int(w3.size) * w3.dtype.itemsize
                    + int(b3.size) * b3.dtype.itemsize)
    io_bytes = 2 * tb * (in_dim * x.dtype.itemsize + out_pad * x.dtype.itemsize)
    scratch_bytes = tb * (h1 + h2 + out_pad) * 4
    need = weight_bytes + io_bytes + scratch_bytes
    vmem_limit = int(min(0.8 * _vmem_capacity_bytes(),
                         max(2 * need, 16 * 2**20)))

    flops = 2 * B * (in_dim * h1 + h1 * h2 + h2 * out_pad)
    bytes_accessed = (int(x.size) * x.dtype.itemsize + weight_bytes
                      + B * out_pad * x.dtype.itemsize)
    cost = pl.CostEstimate(flops=flops, transcendentals=0,
                           bytes_accessed=bytes_accessed)

    def resident(shape):
        # Grid-invariant operand: same (0, 0) block every step. Weights never
        # change across the batch grid, so a single buffer suffices (halves
        # resident weight VMEM vs. the default double buffer).
        if _HAS_PIPELINE_MODE:
            return pl.BlockSpec(shape, lambda i: (0, 0),
                                pipeline_mode=pl.Buffered(1))
        return pl.BlockSpec(shape, lambda i: (0, 0))

    # With < 4 tiles, megacore sharding would just replicate the weight DMA
    # into each v7x core's private VMEM for no pipelining benefit.
    dim_sem = ("parallel",) if num_tiles >= 4 else ("arbitrary",)

    out = pl.pallas_call(
        mlp_kernel,
        out_shape=jax.ShapeDtypeStruct((B, out_pad), x.dtype),
        grid_spec=pltpu.PrefetchScalarGridSpec(
            num_scalar_prefetch=0,
            grid=grid,
            in_specs=[
                pl.BlockSpec((tb, in_dim), lambda i: (i, 0)),  # x tile
                resident((in_dim, h1)),                         # w1
                resident((1, h1)),                              # b1
                resident((h1, h2)),                             # w2
                resident((1, h2)),                              # b2
                resident((h2, out_pad)),                        # w3 (padded)
                resident((1, out_pad)),                         # b3 (padded)
            ],
            out_specs=pl.BlockSpec((tb, out_pad), lambda i: (i, 0)),
        ),
        compiler_params=pltpu.CompilerParams(
            dimension_semantics=dim_sem,
            vmem_limit_bytes=vmem_limit,
        ),
        cost_estimate=cost,
    )(x, params["w1"], params["b1"], params["w2"], params["b2"], w3, b3)

    return out if out_pad == out_dim else out[:, :out_dim]


def init_params(key, input_size, hidden_size1, hidden_size2, output_size,
                dtype=jnp.bfloat16):
    """Deterministic init mirroring nn.Linear's U(-1/sqrt(fan_in), 1/sqrt(fan_in)).
    Weights are stored transposed, (in, out). Default bf16 halves weight
    DMA/VMEM and hits the v6e/v7x bf16 MXU; accumulation stays f32 in-kernel."""
    ks = jax.random.split(key, 6)

    def linear(kw, kb, fan_in, fan_out):
        bound = 1.0 / jnp.sqrt(fan_in)
        w = jax.random.uniform(kw, (fan_in, fan_out), jnp.float32, -bound, bound)
        b = jax.random.uniform(kb, (1, fan_out), jnp.float32, -bound, bound)
        return w.astype(dtype), b.astype(dtype)

    w1, b1 = linear(ks[0], ks[1], input_size, hidden_size1)
    w2, b2 = linear(ks[2], ks[3], hidden_size1, hidden_size2)
    w3, b3 = linear(ks[4], ks[5], hidden_size2, output_size)
    return {"w1": w1, "b1": b1, "w2": w2, "b2": b2, "w3": w3, "b3": b3}


def _reference_forward(x, params):
    """Plain-JAX reference with the same dtype semantics as the kernel
    (cast to weight dtype before each dot, f32 accumulation, f32 VPU math)."""
    w1, b1 = params["w1"], params["b1"]
    w2, b2 = params["w2"], params["b2"]
    w3, b3 = params["w3"], params["b3"]
    h = jnp.dot(x.astype(w1.dtype), w1, preferred_element_type=jnp.float32)
    h = jnp.maximum(h + b1.astype(jnp.float32), 0.0)
    h = jnp.dot(h.astype(w2.dtype), w2, preferred_element_type=jnp.float32)
    h = jnp.maximum(h + b2.astype(jnp.float32), 0.0)
    out = jnp.dot(h.astype(w3.dtype), w3, preferred_element_type=jnp.float32)
    out = out + b3.astype(jnp.float32)
    return out.astype(x.dtype)


if __name__ == "__main__":
    # Small but non-trivial shapes: batch not a multiple of the tile (exercises
    # the masked trailing block), lane-friendly hidden dims, small classifier
    # output (exercises the 128-lane output padding). Weights default to bf16.
    batch, input_size, hidden1, hidden2, output_size = 50, 128, 256, 128, 10

    key = jax.random.PRNGKey(0)
    kx, kp = jax.random.split(key)
    x = jax.random.normal(kx, (batch, input_size), jnp.float32)
    params = init_params(kp, input_size, hidden1, hidden2, output_size)

    out = jax.block_until_ready(mlp_classifier_forward(x, params))

    ref = _reference_forward(x, params)

    assert out.shape == (batch, output_size)
    err = float(jnp.max(jnp.abs(out.astype(jnp.float32) - ref.astype(jnp.float32))))
    # bf16-weight path: both kernel and reference use f32-accumulated bf16 MXU
    # matmuls, so they agree tightly; tolerance covers bf16 rounding variation.
    assert err < 1e-2, f"max abs err {err}"

    print("KERNEL_OK")
</pallas_src>

<mosaic_0001>
module attributes {stable_mosaic.version = 11 : i64} {
  func.func @mlp_kernel(%arg0: i32, %arg1: memref<16x128xf32, #tpu.memory_space<vmem>>, %arg2: memref<128x256xbf16, #tpu.memory_space<vmem>>, %arg3: memref<1x256xbf16, #tpu.memory_space<vmem>>, %arg4: memref<256x128xbf16, #tpu.memory_space<vmem>>, %arg5: memref<1x128xbf16, #tpu.memory_space<vmem>>, %arg6: memref<128x128xbf16, #tpu.memory_space<vmem>>, %arg7: memref<1x128xbf16, #tpu.memory_space<vmem>>, %arg8: memref<16x128xf32, #tpu.memory_space<vmem>>) attributes {dimension_semantics = [#tpu.dimension_semantics<parallel>], iteration_bounds = array<i64: 4>, scalar_prefetch = 0 : i64, scratch_operands = 0 : i64, tpu.core_type = #tpu.core_type<tc>, window_params = [{transform_indices = @transform_0, window_bounds = array<i64: 16, 128>}, {pipeline_mode = #tpu.pipeline_mode<synchronous>, transform_indices = @transform_1, window_bounds = array<i64: 128, 256>}, {pipeline_mode = #tpu.pipeline_mode<synchronous>, transform_indices = @transform_2, window_bounds = array<i64: 1, 256>}, {pipeline_mode = #tpu.pipeline_mode<synchronous>, transform_indices = @transform_3, window_bounds = array<i64: 256, 128>}, {pipeline_mode = #tpu.pipeline_mode<synchronous>, transform_indices = @transform_4, window_bounds = array<i64: 1, 128>}, {pipeline_mode = #tpu.pipeline_mode<synchronous>, transform_indices = @transform_5, window_bounds = array<i64: 128, 128>}, {pipeline_mode = #tpu.pipeline_mode<synchronous>, transform_indices = @transform_6, window_bounds = array<i64: 1, 128>}, {transform_indices = @transform_7, window_bounds = array<i64: 16, 128>}]} {
    %c0 = arith.constant 0 : index
    %c0_0 = arith.constant 0 : index
    %0 = vector.load %arg1[%c0, %c0_0] : memref<16x128xf32, #tpu.memory_space<vmem>>, vector<16x128xf32>
    %1 = arith.truncf %0 : vector<16x128xf32> to vector<16x128xbf16>
    %c0_1 = arith.constant 0 : index
    %c0_2 = arith.constant 0 : index
    %2 = vector.load %arg2[%c0_1, %c0_2] : memref<128x256xbf16, #tpu.memory_space<vmem>>, vector<128x256xbf16>
    %cst = arith.constant dense<0.000000e+00> : vector<16x256xf32>
    %3 = tpu.matmul %1, %2, %cst {dimension_numbers = #tpu.dot_dimension_numbers<[1], [0], [0], [1], [0, 0, 1, 1], [], []>} : vector<16x128xbf16>, vector<128x256xbf16>, vector<16x256xf32> -> vector<16x256xf32>
    %c0_3 = arith.constant 0 : index
    %c0_4 = arith.constant 0 : index
    %4 = vector.load %arg3[%c0_3, %c0_4] : memref<1x256xbf16, #tpu.memory_space<vmem>>, vector<1x256xbf16>
    %5 = arith.extf %4 : vector<1x256xbf16> to vector<1x256xf32>
    %6 = vector.broadcast %5 : vector<1x256xf32> to vector<16x256xf32>
    %7 = arith.addf %3, %6 : vector<16x256xf32>
    %cst_5 = arith.constant 0.000000e+00 : f32
    %8 = vector.broadcast %cst_5 : f32 to vector<16x256xf32>
    %9 = arith.maximumf %7, %8 : vector<16x256xf32>
    %10 = arith.truncf %9 : vector<16x256xf32> to vector<16x256xbf16>
    %c0_6 = arith.constant 0 : index
    %c0_7 = arith.constant 0 : index
    %11 = vector.load %arg4[%c0_6, %c0_7] : memref<256x128xbf16, #tpu.memory_space<vmem>>, vector<256x128xbf16>
    %cst_8 = arith.constant dense<0.000000e+00> : vector<16x128xf32>
    %12 = tpu.matmul %10, %11, %cst_8 {dimension_numbers = #tpu.dot_dimension_numbers<[1], [0], [0], [1], [0, 0, 1, 1], [], []>} : vector<16x256xbf16>, vector<256x128xbf16>, vector<16x128xf32> -> vector<16x128xf32>
    %c0_9 = arith.constant 0 : index
    %c0_10 = arith.constant 0 : index
    %13 = vector.load %arg5[%c0_9, %c0_10] : memref<1x128xbf16, #tpu.memory_space<vmem>>, vector<1x128xbf16>
    %14 = arith.extf %13 : vector<1x128xbf16> to vector<1x128xf32>
    %15 = vector.broadcast %14 : vector<1x128xf32> to vector<16x128xf32>
    %16 = arith.addf %12, %15 : vector<16x128xf32>
    %cst_11 = arith.constant 0.000000e+00 : f32
    %17 = vector.broadcast %cst_11 : f32 to vector<16x128xf32>
    %18 = arith.maximumf %16, %17 : vector<16x128xf32>
    %19 = arith.truncf %18 : vector<16x128xf32> to vector<16x128xbf16>
    %c0_12 = arith.constant 0 : index
    %c0_13 = arith.constant 0 : index
    %20 = vector.load %arg6[%c0_12, %c0_13] : memref<128x128xbf16, #tpu.memory_space<vmem>>, vector<128x128xbf16>
    %cst_14 = arith.constant dense<0.000000e+00> : vector<16x128xf32>
    %21 = tpu.matmul %19, %20, %cst_14 {dimension_numbers = #tpu.dot_dimension_numbers<[1], [0], [0], [1], [0, 0, 1, 1], [], []>} : vector<16x128xbf16>, vector<128x128xbf16>, vector<16x128xf32> -> vector<16x128xf32>
    %c0_15 = arith.constant 0 : index
    %c0_16 = arith.constant 0 : index
    %22 = vector.load %arg7[%c0_15, %c0_16] : memref<1x128xbf16, #tpu.memory_space<vmem>>, vector<1x128xbf16>
    %23 = arith.extf %22 : vector<1x128xbf16> to vector<1x128xf32>
    %24 = vector.broadcast %23 : vector<1x128xf32> to vector<16x128xf32>
    %25 = arith.addf %21, %24 : vector<16x128xf32>
    %c0_17 = arith.constant 0 : index
    %c0_18 = arith.constant 0 : index
    %26 = vector.load %arg8[%c0_17, %c0_18] : memref<16x128xf32, #tpu.memory_space<vmem>>, vector<16x128xf32>
    tpu.vector_store %arg8[%c0_17, %c0_18], %25 {strides = array<i32>} : memref<16x128xf32, #tpu.memory_space<vmem>>, vector<16x128xf32>,
    return
  }
  func.func @transform_0(%arg0: i32) -> (i32, i32) {
    %c0_i32 = arith.constant 0 : i32
    %c0_i32_0 = arith.constant 0 : i32
    return %arg0, %c0_i32 : i32, i32
  }
  func.func @transform_1(%arg0: i32) -> (i32, i32) {
    %c0_i32 = arith.constant 0 : i32
    %c0_i32_0 = arith.constant 0 : i32
    %c0_i32_1 = arith.constant 0 : i32
    return %c0_i32, %c0_i32_0 : i32, i32
  }
  func.func @transform_2(%arg0: i32) -> (i32, i32) {
    %c0_i32 = arith.constant 0 : i32
    %c0_i32_0 = arith.constant 0 : i32
    %c0_i32_1 = arith.constant 0 : i32
    return %c0_i32, %c0_i32_0 : i32, i32
  }
  func.func @transform_3(%arg0: i32) -> (i32, i32) {
    %c0_i32 = arith.constant 0 : i32
    %c0_i32_0 = arith.constant 0 : i32
    %c0_i32_1 = arith.constant 0 : i32
    return %c0_i32, %c0_i32_0 : i32, i32
  }
  func.func @transform_4(%arg0: i32) -> (i32, i32) {
    %c0_i32 = arith.constant 0 : i32
    %c0_i32_0 = arith.constant 0 : i32
    %c0_i32_1 = arith.constant 0 : i32
    return %c0_i32, %c0_i32_0 : i32, i32
  }
  func.func @transform_5(%arg0: i32) -> (i32, i32) {
    %c0_i32 = arith.constant 0 : i32
    %c0_i32_0 = arith.constant 0 : i32
    %c0_i32_1 = arith.constant 0 : i32
    return %c0_i32, %c0_i32_0 : i32, i32
  }
  func.func @transform_6(%arg0: i32) -> (i32, i32) {
    %c0_i32 = arith.constant 0 : i32
    %c0_i32_0 = arith.constant 0 : i32
    %c0_i32_1 = arith.constant 0 : i32
    return %c0_i32, %c0_i32_0 : i32, i32
  }
  func.func @transform_7(%arg0: i32) -> (i32, i32) {
    %c0_i32 = arith.constant 0 : i32
    %c0_i32_0 = arith.constant 0 : i32
    return %arg0, %c0_i32 : i32, i32
  }
}

</mosaic_0001>

<bundles_post_ra>
// kernel: tpu_custom_call.1
= control target key start
LH: loop header
LB: loop body
LE: loop exit
PB: predicated region body
PF: predicated region fallthrough
CT: control target
= control target key end

     0   :  { %s1662_s0 = inlined_call_operand.hbm [shape: f32[50,128], index: 0, kind: input, shape index: {}]   ;;  %s1663_s1 = inlined_call_operand.hbm [shape: bf16[128,256], index: 1, kind: input, shape index: {}]   ;;  %s1664_s2 = inlined_call_operand.vmem [shape: bf16[1,256], index: 2, kind: input, shape index: {}]   ;;  %s1665_s3 = inlined_call_operand.hbm [shape: bf16[256,128], index: 3, kind: input, shape index: {}]   ;;  %s1666_s4 = inlined_call_operand.vmem [shape: bf16[1,128], index: 4, kind: input, shape index: {}]   ;;  %s1667_s5 = inlined_call_operand.hbm [shape: bf16[128,128], index: 5, kind: input, shape index: {}]   ;;  %s1668_s6 = inlined_call_operand.vmem [shape: bf16[1,128], index: 6, kind: input, shape index: {}]   ;;  %s1669_s7 = inlined_call_operand.hbm [shape: f32[50,128], index: 7, kind: output, shape index: {}]  }
   0x1   :  { %1672 = sst [smem:[#allocation16_spill]] %s1663_s1 }
   0x2   :  { %12 = vsyncpa [#allocation3], 0 }
   0x3   :  { %14 = vsyncpa [#allocation3 + $0x1], 0 }
   0x4   :  { %15 = vsyncpa [#allocation6], 0 }
   0x5   :  { %16 = vsyncpa [#allocation9], 0 }
   0x6   :  { %17 = vsyncpa [#allocation4], 0 }
   0x7   :  { %19 = vsyncpa [#allocation4 + $0x1], 0  ;;  %s1424_s24 = smov 0   ;;  %s1426_s25 = smov 0  }
   0x8   :  { %s1428_s26 = smov 0   ;;  %s1430_s27 = smov 0  }
   0x9 LB: > { %s1445_s28 = sadd.s32 4294967295, %s1366_s27   ;;  %s940_s29 = sadd.s32 4294967294, %s1366_s27   ;;  %s1366_s27 = sphi %s1430_s27, %s1692_s27   ;;  %s1362_s26 = sphi %s1428_s26, %s1691_s26   ;;  %s1358_s25 = sphi %s1426_s25, %s1690_s25   ;;  %s1354_s24 = sphi %s1424_s24, %s1689_s24  }
   0xa   : > { %s1449_s30 = sadd.s32 1, %s1366_s27   ;;  %s32_s8 = sadd.s32 1, %s1362_s26 }
   0xb   : > { %s29_s9 = ssub.s32 %s1366_s27, %s1449_s30  ;;  %p39_p0 = scmp.ne.s32.totalorder %s1362_s26, %s1358_s25 }
   0xc   : > { %p30_p1 = scmp.eq.s32.totalorder %s29_s9, 0  ;;  %p40_p2 = scmp.eq.s32.totalorder %s1366_s27, 0 }
   0xd   : > { %p45_p3 = scmp.ne.s32.totalorder %s1358_s25, %s1354_s24  ;;  %p1670_p4 = scmp.eq.s32.totalorder %s1445_s28, 0 }
   0xe   : > { %s1461_s10 = scalar_select %p30_p1, %s1362_s26, %s32_s8  }
   0xf   : > { %p1463_p5 = por %p40_p2, %p39_p0  ;;  %p1469_p6 = por %p1670_p4, %p45_p3 }
  0x10   : > { %1673 = sst [smem:[#allocation15_spill]] %s1461_s10  ;;  %p195_p7 = scmp.eq.s32.totalorder %s1445_s28, 3 }
  0x11   : > { %s1675_s12 = scalar_select %p1469_p6, 1, 0 }
  0x12   : > { %p201_p8 = scmp.eq.s32.totalorder %s940_s29, 3  ;;  %p941_p9 = scmp.ge.s32.totalorder %s1366_s27, 1 }
  0x13   : > { %p208_p10 = scmp.lt.s32.totalorder %s1366_s27, 5  ;;  %p1476_p11 = por %p195_p7, %p39_p0 }
  0x14   : > { %p1480_p12 = por %p201_p8, %p45_p3  ;;  %s1368_s16 = smov [#allocation5]  }
  0x15   : > { %s1676_s13 = scalar_select %p1476_p11, 1, 0 }
  0x16   : > { %s1677_s14 = scalar_select %p1480_p12, 1, 0 }
  0x17   : > { %p1484_p13 = pnand %p941_p9, %p208_p10  ;;  %s220_s17 = sshll.u32 %s1368_s16, 4  ;;  %s221_s17 = int_to_ptr.vmem [resolvable:$true] %s220_s17 }
  0x18   : > { %s1369_s19 = smov [#allocation7]   ;;  %s1201_s21 = scalar_lea.vmem %s221_s17, 2048 }
  0x19   : > { %p1075_p1 = pneg %p1484_p13  ;;  %s236_s20 = sshll.u32 %s1369_s19, 4  ;;  %s237_s20 = int_to_ptr.vmem [resolvable:$true] %s236_s20 }
  0x1a   : > { %p1202_p3 = scmp.ne.s32.totalorder %s221_s17, %s1201_s21  ;;  %p1209_p9 = scmp.lt.s32.totalorder %s221_s17, %s221_s17 }
  0x1b   : > { %p1492_p2 = pnand %p1075_p1, %p1670_p4  ;;  %p1210_p10 = scmp.lt.s32.totalorder %s1201_s21, %s1201_s21 }
  0x1d   : > { %p1192_p0 = pneg %p1492_p2  ;;  %p1211_p12 = por %p1210_p10, %p1209_p9 }
  0x1f   : > { %p1204_p7 = pnand %p1202_p3, %p1192_p0 }
  0x21   : > { %p1205_p8 = pneg %p1204_p7 }
  0x23   : > { %p1212_p1 = pnand %p1211_p12, %p1205_p8 }
  0x25   : > { %1215 = shalt.err (!%p1212_p1)
}
  0x26   : > { %s1370_s22 = smov 128   ;;  %s1371_s23 = smov 8  }
  0x27   : > { %s1680_s1 = sld [smem:[#allocation16_spill]]  ;;  %s1227_s9 = scalar_lea.vmem %s237_s20, 2048 }
  0x28   : > { %p1228_p4 = scmp.ne.s32.totalorder %s237_s20, %s1227_s9  ;;  %p1235_p11 = scmp.lt.s32.totalorder %s237_s20, %s237_s20 }
  0x29   : > { %p1236_p6 = scmp.lt.s32.totalorder %s1227_s9, %s1227_s9 }
  0x2a   : > { %p1230_p3 = pnand %p1228_p4, %p1192_p0 }
  0x2b   : > { %p1237_p9 = por %p1236_p6, %p1235_p11 }
  0x2c   : > { %p1231_p7 = pneg %p1230_p3 }
  0x2d   : > { %1078 = dma.hbm_to_vmem [thread:$0]  (!%p1492_p2), %s1680_s1, 2048, %s221_s17, [#allocation6], %s1370_s22, %s1370_s22, %s1371_s23  }
  0x2e   : > { %p1238_p12 = pnand %p1237_p9, %p1231_p7 }
  0x30   : > { %1241 = shalt.err (!%p1238_p12)
}
  0x31   : > { %s1372_s16 = smov 64   ;;  %s1373_s19 = smov 4  }
  0x32   : > { %1081 = dma.hbm_to_vmem [thread:$0]  (!%p1492_p2), %s1665_s3, 2048, %s237_s20, [#allocation6], %s1372_s16, %s1372_s16, %s1373_s19  }
  0x33   : > { %s1374_s17 = smov [#allocation8]  }
  0x34   : > { %s252_s22 = sshll.u32 %s1374_s17, 4  ;;  %s253_s22 = int_to_ptr.vmem [resolvable:$true] %s252_s22 }
  0x35   : > { %s1253_s23 = scalar_lea.vmem %s253_s22, 1024  ;;  %p1261_p11 = scmp.lt.s32.totalorder %s253_s22, %s253_s22 }
  0x36   : > { %p1254_p4 = scmp.ne.s32.totalorder %s253_s22, %s1253_s23  ;;  %p1262_p10 = scmp.lt.s32.totalorder %s1253_s23, %s1253_s23 }
  0x38   : > { %p1256_p8 = pnand %p1254_p4, %p1192_p0  ;;  %p1263_p1 = por %p1262_p10, %p1261_p11 }
  0x3a   : > { %p1257_p6 = pneg %p1256_p8 }
  0x3c   : > { %p1264_p3 = pnand %p1263_p1, %p1257_p6 }
  0x3e   : > { %1267 = shalt.err (!%p1264_p3)
}
  0x3f   : > { %1084 = dma.hbm_to_vmem [thread:$0]  (!%p1492_p2), %s1667_s5, 1024, %s253_s22, [#allocation9], %s1372_s16, %s1372_s16, %s1373_s19  }
  0x40   : > { %p945_p7 = scmp.ge.s32.totalorder %s1366_s27, 4 }
  0x42   : > { %265 = sbr.rel (%p945_p7) target bundleno = 103 (0x67), region = 40 }
  0x47   : > { %268 = sbr.rel (!%p1463_p5) target bundleno = 103 (0x67), region = 44  ;;  %s269_s10 = sand.u32 (%p1463_p5), 1, %s1362_s26  }
  0x48   : > { %s947_s20 = sshll.u32 (%p1463_p5), %s1366_s27, 1  ;;  %s946_s9 = sshll.u32 (%p1463_p5), %s269_s10, 4 }
  0x49   : > { %s275_s21 = ssub.s32 (%p1463_p5), 7, %s947_s20  ;;  %s1530_s23 = scalar_lea.sflag (%p1463_p5), [#allocation3], %s269_s10 }
  0x4a   : > { %p276_p0 = scmp.lt.s32.totalorder (%p1463_p5), %s275_s21, 2  ;;  %s273_s16 = scalar_lea.vmem (%p1463_p5), [#allocation2], %s946_s9 }
  0x4c   : > { %s1694_s21 = smov (!%p276_p0, %s275_s21), 2 }
  0x4d   : > { %s1527_s17 = sshll.u32 %s1694_s21, 7 }
  0x4e   : > { %s280_s18 = ssub.s32 256, %s1527_s17 }
  0x4f   : > { %281 = vsyncadd %s1530_s23, %s280_s18  ;;  %p949_p5 = scmp.ne.s32.totalorder %s1527_s17, 0  ;;  %s1008_s11 = sshll.u32 %s1366_s27, 8 }
  0x50   : > { %s1538_s29 = scalar_lea.hbm %s1662_s0, %s1008_s11  ;;  %s286_s8 = sshll.u32 %s273_s16, 4  ;;  %s1540_s8 = int_to_ptr.vmem [resolvable:$true] %s286_s8 }
  0x51   : > { %s1268_s10 = scalar_lea.hbm %s1538_s29, %s1527_s17  ;;  %s1272_s21 = scalar_lea.hbm %s1662_s0, 896 }
  0x52   : > { %p1269_p2 = scmp.ne.s32.totalorder %s1538_s29, %s1268_s10  ;;  %p1273_p4 = scmp.lt.s32.totalorder %s1538_s29, %s1662_s0 }
  0x53   : > { %p1274_p8 = scmp.lt.s32.totalorder %s1272_s21, %s1268_s10 }
  0x54   : > { %p1270_p9 = pnand %p1269_p2, %p949_p5 }
  0x55   : > { %p1275_p6 = por %p1274_p8, %p1273_p4 }
  0x56   : > { %p1271_p12 = pneg %p1270_p9 }
  0x58   : > { %p1276_p11 = pnand %p1275_p6, %p1271_p12 }
  0x5a   : > { %1279 = shalt.err (!%p1276_p11)
}
  0x5b   : > { %s1280_s16 = scalar_lea.vmem %s1540_s8, %s1527_s17  ;;  %s1375_s11 = smov [#allocation2]  }
  0x5c   : > { %p1281_p10 = scmp.ne.s32.totalorder %s1540_s8, %s1280_s16  ;;  %s1284_s19 = sshll.u32 %s1375_s11, 4  ;;  %s1285_s19 = int_to_ptr.vmem [resolvable:$false] %s1284_s19 }
  0x5d   : > { %s1286_s22 = scalar_lea.vmem %s1285_s19, 512  ;;  %p1287_p7 = scmp.lt.s32.totalorder %s1540_s8, %s1285_s19 }
  0x5e   : > { %p1282_p1 = pnand %p1281_p10, %p949_p5  ;;  %p1288_p0 = scmp.lt.s32.totalorder %s1286_s22, %s1280_s16 }
  0x60   : > { %p1283_p3 = pneg %p1282_p1  ;;  %p1289_p2 = por %p1288_p0, %p1287_p7 }
  0x62   : > { %p1290_p9 = pnand %p1289_p2, %p1283_p3 }
  0x64   : > { %1293 = shalt.err (!%p1290_p9)
}
  0x65   : > { %s1376_s1 = smov 128   ;;  %s1377_s10 = smov 8  }
  0x66   : > { %292 = dma.hbm_to_vmem [thread:$0]  (%p949_p5), %s1538_s29, %s1527_s17, %s1540_s8, %s1530_s23, %s1376_s1, %s1376_s1, %s1377_s10  }
  0x67 PF: > { %298 = sbr.rel (%p1484_p13) target bundleno = 788 (0x314), region = 48  ;;  %s1569_s20 = sand.u32 (!%p1484_p13), 1, %s1358_s25  }
  0x68   : > { %s954_s9 = sshll.u32 (!%p1484_p13), %s1569_s20, 4  ;;  %s301_s21 = scalar_lea.sflag (!%p1484_p13), [#allocation3], %s1569_s20 }
  0x69   : > { %s1575_s18 = scalar_lea.vmem (!%p1484_p13), [#allocation2], %s954_s9  ;;  %p1681_p12 = scmp.ne.s32.totalorder (!%p1484_p13), %s1675_s12, 0 }
  0x6c   : > { %1337 = dma.done.wait (%p1681_p12), %s301_s21, 256  }
  0x6d   : > { %1339 = vsyncadd (%p1681_p12), %s301_s21, 4294967040  ;;  %p1682_p5 = scmp.eq.s32.totalorder %s1445_s28, 0 }
  0x6f   : > { %1341 = dma.done.wait (%p1682_p5), [#allocation6], 4096   ;;  %p1683_p13 = pmov %p1682_p5 }
  0x70   : > { %p1684_p4 = pmov %p1682_p5 }
  0x71   : > { %1343 = vsyncadd (%p1683_p13), [#allocation6], 4294963200 }
  0x72   : > { %1345 = dma.done.wait (%p1684_p4), [#allocation9], 1024   ;;  %p1685_p8 = pmov %p1684_p4 }
  0x73   : > { %v1378_v0 = vmov 0   ;;  %v1142_v1 = vld [vmem:[#allocation5 + $0x74] ss:$8 sps:$4 sm:$0xff]   ;;  %v1144_v2 = vld [vmem:[#allocation5 + $0x70] ss:$8 sps:$4 sm:$0xff]   ;;  %v1170_v16 = vld [vmem:[#allocation7 + $0x68] sm:$0xff]   ;;  %v380_v41 = vlaneseq }
  0x74   : > { %1347 = vsyncadd (%p1685_p8), [#allocation9], 4294966272  ;;  %510 = vmatprep.mubr.bf16.mxu0 %v1378_v0  ;;  %478 = vmatprep.subr.bf16.mxu0 %v1142_v1  ;;  %v1145_v3 = vld [vmem:[#allocation5 + $0x64] ss:$8 sps:$4 sm:$0xff]   ;;  %v1147_v4 = vld [vmem:[#allocation5 + $0x60] ss:$8 sps:$4 sm:$0xff]  }
  0x75   : > { %479 = vmatpush1.bf16.msra.mxu0 %v1144_v2  ;;  %v1148_v5 = vld [vmem:[#allocation5 + $0x54] ss:$8 sps:$4 sm:$0xff]   ;;  %v1150_v6 = vld [vmem:[#allocation5 + $0x50] ss:$8 sps:$4 sm:$0xff]   ;;  %v1151_v7 = vld [vmem:[#allocation5 + $0x44] ss:$8 sps:$4 sm:$0xff]  }
  0x76   : > { %480 = vmatprep.subr.bf16.mxu0 %v1145_v3  ;;  %v1153_v8 = vld [vmem:[#allocation5 + $0x40] ss:$8 sps:$4 sm:$0xff]   ;;  %v1154_v9 = vld [vmem:[#allocation5 + $0x34] ss:$8 sps:$4 sm:$0xff]   ;;  %v1156_v11 = vld [vmem:[#allocation5 + $0x30] ss:$8 sps:$4 sm:$0xff]  }
  0x77   : > { %v1166_v10 = vld [vmem:[#allocation7 + $0x78] sm:$0xff]   ;;  %v1157_v13 = vld [vmem:[#allocation5 + $0x24] ss:$8 sps:$4 sm:$0xff]   ;;  %v1168_v14 = vld [vmem:[#allocation7 + $0x70] sm:$0xff]   ;;  %v1379_v37 = vmov 0.0   ;;  %v381_v42 = vshrl.u32 %v380_v41, 7 }
  0x78   : > { %v1167_v12 = vld [vmem:[#allocation7 + $0x38] sm:$0xff]   ;;  %1010 = vmatprep.subr.bf16.mxu1 %v1166_v10  ;;  %v1169_v15 = vld [vmem:[#allocation7 + $0x30] sm:$0xff]   ;;  %v1159_v17 = vld [vmem:[#allocation5 + $0x20] ss:$8 sps:$4 sm:$0xff]   ;;  %vm1380_vm0 = vmmov 0   ;;  %s346_s16 = scalar_lea.vmem [#allocation10], %s954_s9 }
  0x79   : > { %481 = vmatpush1.bf16.msra.mxu0 %v1147_v4  ;;  %1011 = vmatpush3.bf16.msra.mxu1 %v1167_v12  ;;  %v1160_v18 = vld [vmem:[#allocation5 + $0x14] ss:$8 sps:$4 sm:$0xff]   ;;  %v1171_v19 = vld [vmem:[#allocation7 + $0x28] sm:$0xff]   ;;  %v1172_v20 = vld [vmem:[#allocation7 + $0x60] sm:$0xff]   ;;  %v386_v44 = vsub.s32 2, %v381_v42  ;;  %v382_v46 = vsub.s32 0, %v381_v42 }
  0x7a   : > { %482 = vmatprep.subr.bf16.mxu0 %v1148_v5  ;;  %1012 = vmatprep.subr.bf16.mxu1 %v1168_v14  ;;  %v1162_v21 = vld [vmem:[#allocation5 + $0x10] ss:$8 sps:$4 sm:$0xff]   ;;  %v1173_v22 = vld [vmem:[#allocation7 + $0x20] sm:$0xff]   ;;  %v1178_v32 = vld [vmem:[#allocation7 + $0x48] sm:$0xff]   ;;  %s819_s11 = scalar_lea.sflag [#allocation4], %s1569_s20  ;;  %p1686_p6 = scmp.ne.s32.totalorder %s1676_s13, 0 }
  0x7b   : > { %v1163_v23 = vld [vmem:[#allocation5 + $0x4] ss:$8 sps:$4 sm:$0xff]   ;;  %v1174_v24 = vld [vmem:[#allocation7 + $0x58] sm:$0xff]   ;;  %v1165_v25 = vld [vmem:[#allocation5] ss:$8 sps:$4 sm:$0xff]   ;;  %s1000_s19 = sshll.u32 (%p1686_p6), %s1445_s28, 1 }
  0x7c   : > { %v358_v26 = vld [vmem:[%s1575_s18] sm:$0xff]  ;;  %v359_v27 = vld [vmem:[%s1575_s18 + $0x8] sm:$0xff]  ;;  %s827_s22 = ssub.s32 (%p1686_p6), 7, %s1000_s19 }
  0x7d   : > { %483 = vmatpush1.bf16.msra.mxu0 %v1150_v6  ;;  %1013 = vmatpush3.bf16.msra.mxu1 %v1169_v15  ;;  %v1175_v28 = vld [vmem:[#allocation7 + $0x18] sm:$0xff]   ;;  %v360_v29 = vpack.c.bf16 %v359_v27, %v358_v26  ;;  %v1176_v30 = vld [vmem:[#allocation7 + $0x50] sm:$0xff]   ;;  %v1179_v33 = vld [vmem:[#allocation7 + $0x8] sm:$0xff]   ;;  %p828_p11 = scmp.lt.s32.totalorder (%p1686_p6), %s827_s22, 2 }
  0x7e   : > { %484 = vmatprep.subr.bf16.mxu0 %v1151_v7  ;;  %1014 = vmatprep.subr.bf16.mxu1 %v1170_v16  ;;  %v1177_v31 = vld [vmem:[#allocation7 + $0x10] sm:$0xff]   ;;  %v1180_v34 = vld [vmem:[#allocation7 + $0x40] sm:$0xff]   ;;  %v1182_v36 = vld [vmem:[#allocation8 + $0x38] sm:$0xff]  }
  0x7f   : > { %v1181_v35 = vld [vmem:[#allocation7] sm:$0xff]   ;;  %v1183_v38 = vld [vmem:[#allocation8 + $0x30] sm:$0xff]   ;;  %v1184_v39 = vld [vmem:[#allocation8 + $0x28] sm:$0xff]  }
  0x80   : > { %v1185_v40 = vld [vmem:[#allocation8 + $0x20] sm:$0xff]   ;;  %v1186_v1 = vld [vmem:[#allocation8 + $0x18] sm:$0xff]   ;;  %v1187_v2 = vld [vmem:[#allocation8 + $0x10] sm:$0xff]  }
  0x81   : > { %485 = vmatpush1.bf16.msra.mxu0 %v1153_v8  ;;  %1015 = vmatpush3.bf16.msra.mxu1 %v1171_v19  ;;  %v377_v43 = vld [vmem:[%s1664_s2] sm:$0x3]  ;;  %v1188_v3 = vld [vmem:[#allocation8 + $0x8] sm:$0xff]  }
  0x82   : > { %486 = vmatprep.subr.bf16.mxu0 %v1154_v9  ;;  %1016 = vmatprep.subr.bf16.mxu1 %v1172_v20  ;;  %v378_v45 = vunpack.c.l.bf16 %v377_v43  ;;  %v1189_v4 = vld [vmem:[#allocation8] sm:$0xff]  }
  0x83   : > { %v559_v5 = vld [vmem:[%s1666_s4] sm:$0x1] }
  0x84   : > { %v387_v47 = vrot.slane %v378_v45, %v386_v44  ;;  %v383_v48 = vrot.slane %v378_v45, %v382_v46  ;;  %v560_v6 = vunpack.c.l.bf16 %v559_v5  ;;  %v721_v19 = vld [vmem:[%s1668_s6] sm:$0x1] }
  0x85   : > { %487 = vmatpush1.bf16.msra.mxu0 %v1156_v11  ;;  %1017 = vmatpush3.bf16.msra.mxu1 %v1173_v22  ;;  %v722_v20 = vunpack.c.l.bf16 %v721_v19 }
  0x86   : > { %488 = vmatprep.subr.bf16.mxu0 %v1157_v13  ;;  %1018 = vmatprep.subr.bf16.mxu1 %v1174_v24  ;;  %v397_v50 = vrot.slane %v387_v47, %v382_v46  ;;  %v393_v51 = vrot.slane %v383_v48, %v382_v46  ;;  %v564_v9 = vrot.slane %v560_v6, %v382_v46 }
  0x89   : > { %489 = vmatpush1.bf16.msra.mxu0 %v1159_v17  ;;  %1019 = vmatpush3.bf16.msra.mxu1 %v1175_v28 }
  0x8a   : > { %490 = vmatprep.subr.bf16.mxu0 %v1160_v18  ;;  %1020 = vmatprep.subr.bf16.mxu1 %v1176_v30 }
  0x8d   : > { %491 = vmatpush1.bf16.msra.mxu0 %v1162_v21  ;;  %1021 = vmatpush3.bf16.msra.mxu1 %v1177_v31  ;;  %v726_v21 = vrot.slane %v722_v20, %v382_v46 }
  0x8e   : > { %492 = vmatprep.subr.bf16.mxu0 %v1163_v23  ;;  %1022 = vmatprep.subr.bf16.mxu1 %v1178_v32 }
  0x91   : > { %493 = vmatpush1.bf16.msra.mxu0 %v1165_v25  ;;  %1023 = vmatpush3.bf16.msra.mxu1 %v1179_v33 }
  0x92   : > { %1024 = vmatprep.subr.bf16.mxu1 %v1180_v34  ;;  %1041 = vmatprep.subr.bf16.mxu0 %v1379_v37 }
  0x94   : > { %511 = vmatmul.mubr.bf16.vlgmr.msra.gmra.mxu0 %v360_v29 }
  0x95   : > { %1025 = vmatpush3.bf16.msra.mxu1 %v1181_v35  ;;  %1042 = vmatpush3.bf16.msra.mxu0 %v1182_v36 }
  0x96   : > { %1043 = vmatprep.subr.bf16.mxu0 %v1379_v37  ;;  %1057 = vmatprep.mubr.msk.bf16.mxu0 %vm1380_vm0, %v1379_v37 }
  0x99   : > { %1044 = vmatpush3.bf16.msra.mxu0 %v1183_v38 }
  0x9a   : > { %1045 = vmatprep.subr.bf16.mxu0 %v1379_v37 }
  0x9d   : > { %1046 = vmatpush3.bf16.msra.mxu0 %v1184_v39 }
  0x9e   : > { %1047 = vmatprep.subr.bf16.mxu0 %v1379_v37 }
  0xa1   : > { %1048 = vmatpush3.bf16.msra.mxu0 %v1185_v40 }
  0xa2   : > { %1049 = vmatprep.subr.bf16.mxu0 %v1379_v37 }
  0xa5   : > { %1050 = vmatpush3.bf16.msra.mxu0 %v1186_v1 }
  0xa6   : > { %1051 = vmatprep.subr.bf16.mxu0 %v1379_v37 }
  0xa9   : > { %1052 = vmatpush3.bf16.msra.mxu0 %v1187_v2 }
  0xaa   : > { %1053 = vmatprep.subr.bf16.mxu0 %v1379_v37 }
  0xad   : > { %1054 = vmatpush3.bf16.msra.mxu0 %v1188_v3 }
  0xae   : > { %1055 = vmatprep.subr.bf16.mxu0 %v1379_v37 }
  0xb1   : > { %1056 = vmatpush3.bf16.msra.mxu0 %v1189_v4 }
 0x154   : > { %v512_v49 = vpop.f32.mrf.mxu0 }
 0x155   : > { %v513_v56 = vadd.f32 %v512_v49, %v393_v51 }
 0x156   : > { %v514_v52 = vpop.f32.mrf.mxu0 }
 0x157   : > { %v515_v54 = vadd.f32 %v514_v52, %v397_v50  ;;  %v521_v62 = vmax.f32 %v513_v56, 0.0 }
 0x158   : > { %v516_v53 = vpop.f32.mrf.mxu0 }
 0x159   : > { %v517_v55 = vadd.f32 %v516_v53, %v393_v51  ;;  %v522_v60 = vmax.f32 %v515_v54, 0.0 }
 0x15a   : > { %v518_v57 = vpop.f32.mrf.mxu0 }
 0x15b   : > { %v519_v58 = vadd.f32 %v518_v57, %v397_v50  ;;  %v523_v59 = vmax.f32 %v517_v55, 0.0 }
 0x15d   : > { %v524_v61 = vmax.f32 %v519_v58, 0.0  ;;  %v525_v0 = vpack.c.bf16 %v523_v59, %v521_v62 }
 0x15f   : > { %v526_v63 = vpack.c.bf16 %v524_v61, %v522_v60 }
 0x161   : > { %693 = vmatprep.mubr.bf16.mxu1 %v526_v63 }
 0x162   : > { %694 = vmatmul.mubr.bf16.vlgmr.msra.gmra.mxu1 %v525_v0 }
 0x222   : > { %v1026_v7 = vpop.f32.mrf.mxu1 }
 0x224   : > { %v1027_v8 = vpop.f32.mrf.mxu1 }
 0x225   : > { %v1028_v10 = vadd.f32 %v1027_v8, %v1026_v7 }
 0x226   : > { %v1029_v11 = vpop.f32.mrf.mxu1 }
 0x227   : > { %v696_v13 = vadd.f32 %v1028_v10, %v564_v9 }
 0x228   : > { %v1030_v12 = vpop.f32.mrf.mxu1 }
 0x229   : > { %v1031_v14 = vadd.f32 %v1030_v12, %v1029_v11  ;;  %v702_v16 = vmax.f32 %v696_v13, 0.0 }
 0x22b   : > { %v699_v15 = vadd.f32 %v1031_v14, %v564_v9 }
 0x22d   : > { %v703_v17 = vmax.f32 %v699_v15, 0.0 }
 0x22f   : > { %v704_v18 = vpack.c.bf16 %v703_v17, %v702_v16 }
 0x231   : > { %1058 = vmatmul.mubr.bf16.vlgmr.msra.gmra.mxu0 %v704_v18 }
 0x2f1   : > { %v809_v22 = vpop.f32.mrf.mxu0 }
 0x2f2   : > { %v810_v23 = vadd.f32 %v809_v22, %v726_v21 }
 0x2f3   : > { %v1059_v24 = vpop.f32.mrf.mxu0 }
 0x2f4   : > { %816 = vst [vmem:[%s346_s16] sm:$0xff] %v810_v23  ;;  %825 = sbr.rel (!%p1686_p6) target bundleno = 788 (0x314), region = 68 }
 0x2f5   : > { %v812_v25 = vpop.f32.mrf.mxu0 }
 0x2f6   : > { %v813_v26 = vadd.f32 %v812_v25, %v726_v21 }
 0x2f7   : > { %v1060_v27 = vpop.f32.mrf.mxu0 }
 0x2f8   : > { %817 = vst [vmem:[%s346_s16 + $0x8] sm:$0xff] %v813_v26 }
 0x2f9   : > { %s1696_s22 = smov (!%p828_p11, %s827_s22), 2 }
 0x2fa   : > { %s1606_s1 = sshll.u32 %s1696_s22, 7 }
 0x2fb   : > { %s832_s10 = ssub.s32 256, %s1606_s1 }
 0x2fc   : > { %833 = vsyncadd %s819_s11, %s832_s10  ;;  %p1002_p10 = scmp.ne.s32.totalorder %s1606_s1, 0  ;;  %s1009_s9 = sshll.u32 %s1445_s28, 8 }
 0x2fd   : > { %s1616_s18 = scalar_lea.hbm %s1669_s7, %s1009_s9  ;;  %s838_s12 = sshll.u32 %s346_s16, 4  ;;  %s1618_s12 = int_to_ptr.vmem [resolvable:$true] %s838_s12 }
 0x2fe   : > { %s1294_s15 = scalar_lea.vmem %s1618_s12, %s1606_s1  ;;  %s1381_s17 = smov [#allocation10]  }
 0x2ff   : > { %p1295_p1 = scmp.ne.s32.totalorder %s1618_s12, %s1294_s15  ;;  %s1298_s23 = sshll.u32 %s1381_s17, 4  ;;  %s1299_s23 = int_to_ptr.vmem [resolvable:$false] %s1298_s23 }
 0x300   : > { %s1300_s28 = scalar_lea.vmem %s1299_s23, 512  ;;  %p1301_p0 = scmp.lt.s32.totalorder %s1618_s12, %s1299_s23 }
 0x301   : > { %p1296_p3 = pnand %p1295_p1, %p1002_p10  ;;  %p1302_p2 = scmp.lt.s32.totalorder %s1300_s28, %s1294_s15 }
 0x303   : > { %p1297_p7 = pneg %p1296_p3  ;;  %p1303_p9 = por %p1302_p2, %p1301_p0 }
 0x305   : > { %p1304_p12 = pnand %p1303_p9, %p1297_p7 }
 0x307   : > { %1307 = shalt.err (!%p1304_p12)
}
 0x308   : > { %s1308_s29 = scalar_lea.hbm %s1616_s18, %s1606_s1  ;;  %s1312_s19 = scalar_lea.hbm %s1669_s7, 896 }
 0x309   : > { %p1309_p5 = scmp.ne.s32.totalorder %s1616_s18, %s1308_s29  ;;  %p1313_p8 = scmp.lt.s32.totalorder %s1616_s18, %s1669_s7 }
 0x30a   : > { %p1314_p6 = scmp.lt.s32.totalorder %s1312_s19, %s1308_s29 }
 0x30b   : > { %p1310_p13 = pnand %p1309_p5, %p1002_p10 }
 0x30c   : > { %p1315_p11 = por %p1314_p6, %p1313_p8 }
 0x30d   : > { %p1311_p4 = pneg %p1310_p13 }
 0x30f   : > { %p1316_p1 = pnand %p1315_p11, %p1311_p4 }
 0x311   : > { %1319 = shalt.err (!%p1316_p1)
}
 0x312   : > { %s1382_s9 = smov 128   ;;  %s1383_s13 = smov 8  }
 0x313   : > { %844 = dma.vmem_to_hbm [thread:$0]  (%p1002_p10), %s1618_s12, %s1606_s1, %s1616_s18, %s819_s11, %s1382_s9, %s1382_s9, %s1383_s13  }
 0x314 PF: > { %p1095_p3 = scmp.ge.s32.totalorder %s1366_s27, 2  ;;  %s853_s21 = sand.u32 1, %s1354_s24  }
 0x315   : > { %p1687_p7 = scmp.ne.s32.totalorder %s1677_s14, 0  ;;  %s854_s15 = scalar_lea.sflag [#allocation4], %s853_s21 }
 0x317   : > { %p1086_p0 = pnand %p1095_p3, %p1687_p7 }
 0x319   : > { %p1087_p2 = pneg %p1086_p0 }
 0x31b   : > { %1349 = dma.done.wait (%p1087_p2), %s854_s15, 256  }
 0x31c   : > { %1351 = vsyncadd (%p1087_p2), %s854_s15, 4294967040  ;;  %s1688_s17 = sld [smem:[#allocation15_spill]]  ;;  %p22_p9 = scmp.ge.s32.totalorder %s1449_s30, 6  }
 0x31d   : > { %s1689_s24 = smov %s1358_s25  ;;  %s1690_s25 = smov %s1362_s26 }
 0x31e   : > { %s1692_s27 = smov %s1449_s30  ;;  %24 = sbr.rel (!%p22_p9) target bundleno = 9 (0x9), region = 105 }
 0x322   : > { %s1691_s26 = smov %s1688_s17 }
 0x323   :  { %859 = vsyncpa [#allocation3], 1 }
 0x324   :  { %861 = vsyncpa [#allocation3 + $0x1], 1 }
 0x325   :  { %862 = vsyncpa [#allocation6], 1 }
 0x326   :  { %863 = vsyncpa [#allocation9], 1 }
 0x327   :  { %864 = vsyncpa [#allocation4], 1 }
 0x328   :  { %866 = vsyncpa [#allocation4 + $0x1], 1 }

</bundles_post_ra>
